<compile_context>
chip_gen: v7x
topology: tpu7x:2x2x1
jax: 0.10.0
libtpu: 0.0.40
codegen_flags: <defaults>
</compile_context>

<pallas_src>
import functools

import jax
import jax.numpy as jnp
import numpy as np
from jax import lax
from jax.experimental import pallas as pl
from jax.experimental.pallas import tpu as pltpu

EPS = 1e-6


def _round_up(x: int, m: int) -> int:
    return (x + m - 1) // m * m


def encoder_kernel(x_ref, w_ref, b_ref, o_ref, *, num_layers, d_actual, d_pad):
    # x_ref: (TM, Dp)   w_ref: (L, Dp, Dp)   b_ref: (L, 1, Dp)   o_ref: (TM, Dp)
    # Keep the activation in values — no VMEM scratch round-trip per layer.
    h = x_ref[...].astype(jnp.float32)

    def layer(l, h):
        return (
            jnp.dot(
                h,
                w_ref[l],
                preferred_element_type=jnp.float32,
                precision=lax.Precision.HIGHEST,
            )
            + b_ref[l].astype(jnp.float32)
        )

    h = lax.fori_loop(0, num_layers, layer, h, unroll=True)

    inv_d = 1.0 / float(d_actual)
    inv_dm1 = 1.0 / float(d_actual - 1)

    if d_pad == d_actual:
        mean = jnp.sum(h, axis=-1, keepdims=True) * inv_d
        centered = h - mean
    else:
        # Padded lanes of h are exactly zero (zero-padded x / W / b), but the
        # centered values would not be — mask them out of the reductions.
        lane = lax.broadcasted_iota(jnp.int32, h.shape, 1)
        valid = lane < d_actual
        mean = jnp.sum(jnp.where(valid, h, 0.0), axis=-1, keepdims=True) * inv_d
        centered = jnp.where(valid, h - mean, 0.0)

    # torch.std default is unbiased (Bessel correction): divide by D - 1.
    var = jnp.sum(centered * centered, axis=-1, keepdims=True) * inv_dm1
    std = jnp.sqrt(var)
    # Exact divide (one per row tile) — the approximate EUP reciprocal was the
    # source of the previous tolerance failure.
    o_ref[...] = (centered / (std + EPS)).astype(o_ref.dtype)


def encoder_forward(x, weights, biases, *, tm=256):
    """x: (B, S, D); weights: (L, D, D); biases: (L, 1, D)."""
    B, S, D = x.shape
    L = weights.shape[0]
    M = B * S

    # Lane-dense padding of the model dimension.
    d_pad = _round_up(max(D, 128), 128)
    # Row tile: multiple of 8 sublanes, capped by the (padded) row count.
    tm = min(tm, _round_up(M, 8))
    m_pad = _round_up(M, tm)

    x2 = x.reshape(M, D).astype(jnp.float32)
    x2 = jnp.pad(x2, ((0, m_pad - M), (0, d_pad - D)))
    w_p = jnp.pad(weights, ((0, 0), (0, d_pad - D), (0, d_pad - D)))
    b_p = jnp.pad(biases, ((0, 0), (0, 0), (0, d_pad - D)))

    grid = (m_pad // tm,)

    itemsize = jnp.dtype(w_p.dtype).itemsize
    w_bytes = L * d_pad * d_pad * itemsize
    b_bytes = L * d_pad * itemsize
    tile_bytes = tm * d_pad * 4
    # resident weights + double-buffered input/output tiles + slack
    vmem_needed = 2 * (w_bytes + b_bytes) + 4 * tile_bytes + (2 << 20)
    vmem_limit = int(min(max(vmem_needed, 16 << 20), 60 << 20))

    cost = pl.CostEstimate(
        flops=2 * L * m_pad * d_pad * d_pad,
        transcendentals=2 * m_pad,
        bytes_accessed=2 * m_pad * d_pad * 4 + w_bytes + b_bytes,
    )

    out = pl.pallas_call(
        functools.partial(
            encoder_kernel, num_layers=L, d_actual=D, d_pad=d_pad
        ),
        out_shape=jax.ShapeDtypeStruct((m_pad, d_pad), jnp.float32),
        grid=grid,
        in_specs=[
            pl.BlockSpec((tm, d_pad), lambda i: (i, 0)),
            # Constant block index: weights/biases stay resident across rows.
            pl.BlockSpec((L, d_pad, d_pad), lambda i: (0, 0, 0)),
            pl.BlockSpec((L, 1, d_pad), lambda i: (0, 0, 0)),
        ],
        out_specs=pl.BlockSpec((tm, d_pad), lambda i: (i, 0)),
        compiler_params=pltpu.CompilerParams(
            dimension_semantics=("parallel",),
            vmem_limit_bytes=vmem_limit,
        ),
        cost_estimate=cost,
    )(x2, w_p, b_p)

    return out[:M, :D].reshape(B, S, D)


def encoder_reference(x, weights, biases):
    """Pure-JAX reference mirroring the PyTorch forward (f32, highest precision)."""
    B, S, D = x.shape
    h = x.reshape(B * S, D).astype(jnp.float32)
    for l in range(weights.shape[0]):
        h = (
            jnp.dot(h, weights[l], precision=lax.Precision.HIGHEST)
            + biases[l]
        )
    mean = jnp.mean(h, axis=-1, keepdims=True)
    std = jnp.sqrt(jnp.sum((h - mean) ** 2, axis=-1, keepdims=True) / (D - 1))
    return ((h - mean) / (std + EPS)).reshape(B, S, D)


if __name__ == "__main__":
    B, S, D, L = 2, 8, 32, 2  # batch, seq, d_model, num layers

    key = jax.random.PRNGKey(0)
    kx, kw, kb = jax.random.split(key, 3)

    x = jax.random.normal(kx, (B, S, D), dtype=jnp.float32)
    # Deterministic small-scale parameter init (synthetic, not a checkpoint).
    weights = 0.1 * jax.random.normal(kw, (L, D, D), dtype=jnp.float32)
    biases = 0.1 * jax.random.normal(kb, (L, 1, D), dtype=jnp.float32)

    out = encoder_forward(x, weights, biases)
    out = jax.block_until_ready(out)

    ref = encoder_reference(x, weights, biases)
    np.testing.assert_allclose(np.asarray(out), np.asarray(ref), rtol=2e-3, atol=2e-3)

    print("KERNEL_OK")
</pallas_src>

<mosaic_0001>
module attributes {stable_mosaic.version = 11 : i64} {
  func.func @encoder_kernel(%arg0: i32, %arg1: memref<16x128xf32, #tpu.memory_space<vmem>>, %arg2: memref<2x128x128xf32, #tpu.memory_space<vmem>>, %arg3: memref<2x1x128xf32, #tpu.memory_space<vmem>>, %arg4: memref<16x128xf32, #tpu.memory_space<vmem>>) attributes {dimension_semantics = [#tpu.dimension_semantics<parallel>], iteration_bounds = array<i64: 1>, scalar_prefetch = 0 : i64, scratch_operands = 0 : i64, tpu.core_type = #tpu.core_type<tc>, window_params = [{transform_indices = @transform_0, window_bounds = array<i64: 16, 128>}, {pipeline_mode = #tpu.pipeline_mode<synchronous>, transform_indices = @transform_1, window_bounds = array<i64: 2, 128, 128>}, {pipeline_mode = #tpu.pipeline_mode<synchronous>, transform_indices = @transform_2, window_bounds = array<i64: 2, 1, 128>}, {transform_indices = @transform_3, window_bounds = array<i64: 16, 128>}]} {
    %c0 = arith.constant 0 : index
    %c0_0 = arith.constant 0 : index
    %0 = vector.load %arg1[%c0, %c0_0] : memref<16x128xf32, #tpu.memory_space<vmem>>, vector<16x128xf32>
    %c0_i32 = arith.constant 0 : i32
    %1 = arith.index_cast %c0_i32 : i32 to index
    %c0_1 = arith.constant 0 : index
    %c0_2 = arith.constant 0 : index
    %2 = vector.load %arg2[%1, %c0_1, %c0_2] : memref<2x128x128xf32, #tpu.memory_space<vmem>>, vector<1x128x128xf32>
    %3 = vector.shape_cast %2 : vector<1x128x128xf32> to vector<128x128xf32>
    %cst = arith.constant dense<0.000000e+00> : vector<16x128xf32>
    %4 = tpu.matmul %0, %3, %cst {dimension_numbers = #tpu.dot_dimension_numbers<[1], [0], [0], [1], [0, 0, 1, 1], [], []>, precision = #tpu.contract_precision<fp32>} : vector<16x128xf32>, vector<128x128xf32>, vector<16x128xf32> -> vector<16x128xf32>
    %5 = arith.index_cast %c0_i32 : i32 to index
    %c0_3 = arith.constant 0 : index
    %c0_4 = arith.constant 0 : index
    %6 = vector.load %arg3[%5, %c0_3, %c0_4] : memref<2x1x128xf32, #tpu.memory_space<vmem>>, vector<1x1x128xf32>
    %7 = vector.shape_cast %6 : vector<1x1x128xf32> to vector<1x128xf32>
    %8 = vector.broadcast %7 : vector<1x128xf32> to vector<16x128xf32>
    %9 = arith.addf %4, %8 : vector<16x128xf32>
    %c1_i32 = arith.constant 1 : i32
    %10 = arith.index_cast %c1_i32 : i32 to index
    %c0_5 = arith.constant 0 : index
    %c0_6 = arith.constant 0 : index
    %11 = vector.load %arg2[%10, %c0_5, %c0_6] : memref<2x128x128xf32, #tpu.memory_space<vmem>>, vector<1x128x128xf32>
    %12 = vector.shape_cast %11 : vector<1x128x128xf32> to vector<128x128xf32>
    %cst_7 = arith.constant dense<0.000000e+00> : vector<16x128xf32>
    %13 = tpu.matmul %9, %12, %cst_7 {dimension_numbers = #tpu.dot_dimension_numbers<[1], [0], [0], [1], [0, 0, 1, 1], [], []>, precision = #tpu.contract_precision<fp32>} : vector<16x128xf32>, vector<128x128xf32>, vector<16x128xf32> -> vector<16x128xf32>
    %14 = arith.index_cast %c1_i32 : i32 to index
    %c0_8 = arith.constant 0 : index
    %c0_9 = arith.constant 0 : index
    %15 = vector.load %arg3[%14, %c0_8, %c0_9] : memref<2x1x128xf32, #tpu.memory_space<vmem>>, vector<1x1x128xf32>
    %16 = vector.shape_cast %15 : vector<1x1x128xf32> to vector<1x128xf32>
    %17 = vector.broadcast %16 : vector<1x128xf32> to vector<16x128xf32>
    %18 = arith.addf %13, %17 : vector<16x128xf32>
    %c2_i32 = arith.constant 2 : i32
    %19 = tpu.iota {dimensions = array<i32: 1>} : vector<16x128xi32>
    %c32_i32 = arith.constant 32 : i32
    %20 = vector.broadcast %c32_i32 : i32 to vector<16x128xi32>
    %21 = arith.cmpi slt, %19, %20 : vector<16x128xi32>
    %cst_10 = arith.constant 0.000000e+00 : f32
    %22 = vector.broadcast %cst_10 : f32 to vector<16x128xf32>
    %23 = arith.select %21, %18, %22 : vector<16x128xi1>, vector<16x128xf32>
    %cst_11 = arith.constant dense<0.000000e+00> : vector<16xf32>
    %24 = vector.multi_reduction <add>, %23, %cst_11 [1] : vector<16x128xf32> to vector<16xf32>
    %25 = vector.shape_cast %24 : vector<16xf32> to vector<16x1xf32>
    %cst_12 = arith.constant 3.125000e-02 : f32
    %26 = vector.broadcast %cst_12 : f32 to vector<16x1xf32>
    %27 = arith.mulf %25, %26 : vector<16x1xf32>
    %28 = vector.broadcast %27 : vector<16x1xf32> to vector<16x128xf32>
    %29 = arith.subf %18, %28 : vector<16x128xf32>
    %cst_13 = arith.constant 0.000000e+00 : f32
    %30 = vector.broadcast %cst_13 : f32 to vector<16x128xf32>
    %31 = arith.select %21, %29, %30 : vector<16x128xi1>, vector<16x128xf32>
    %32 = arith.mulf %31, %31 : vector<16x128xf32>
    %cst_14 = arith.constant dense<0.000000e+00> : vector<16xf32>
    %33 = vector.multi_reduction <add>, %32, %cst_14 [1] : vector<16x128xf32> to vector<16xf32>
    %34 = vector.shape_cast %33 : vector<16xf32> to vector<16x1xf32>
    %cst_15 = arith.constant 0.0322580636 : f32
    %35 = vector.broadcast %cst_15 : f32 to vector<16x1xf32>
    %36 = arith.mulf %34, %35 : vector<16x1xf32>
    %37 = math.sqrt %36 : vector<16x1xf32>
    %cst_16 = arith.constant 9.99999997E-7 : f32
    %38 = vector.broadcast %cst_16 : f32 to vector<16x1xf32>
    %39 = arith.addf %37, %38 : vector<16x1xf32>
    %40 = vector.broadcast %39 : vector<16x1xf32> to vector<16x128xf32>
    %41 = arith.divf %31, %40 : vector<16x128xf32>
    %c0_17 = arith.constant 0 : index
    %c0_18 = arith.constant 0 : index
    %42 = vector.load %arg4[%c0_17, %c0_18] : memref<16x128xf32, #tpu.memory_space<vmem>>, vector<16x128xf32>
    tpu.vector_store %arg4[%c0_17, %c0_18], %41 {strides = array<i32>} : memref<16x128xf32, #tpu.memory_space<vmem>>, vector<16x128xf32>,
    return
  }
  func.func @transform_0(%arg0: i32) -> (i32, i32) {
    %c0_i32 = arith.constant 0 : i32
    %c0_i32_0 = arith.constant 0 : i32
    return %arg0, %c0_i32 : i32, i32
  }
  func.func @transform_1(%arg0: i32) -> (i32, i32, i32) {
    %c0_i32 = arith.constant 0 : i32
    %c0_i32_0 = arith.constant 0 : i32
    %c0_i32_1 = arith.constant 0 : i32
    %c0_i32_2 = arith.constant 0 : i32
    return %c0_i32, %c0_i32_0, %c0_i32_1 : i32, i32, i32
  }
  func.func @transform_2(%arg0: i32) -> (i32, i32, i32) {
    %c0_i32 = arith.constant 0 : i32
    %c0_i32_0 = arith.constant 0 : i32
    %c0_i32_1 = arith.constant 0 : i32
    %c0_i32_2 = arith.constant 0 : i32
    return %c0_i32, %c0_i32_0, %c0_i32_1 : i32, i32, i32
  }
  func.func @transform_3(%arg0: i32) -> (i32, i32) {
    %c0_i32 = arith.constant 0 : i32
    %c0_i32_0 = arith.constant 0 : i32
    return %arg0, %c0_i32 : i32, i32
  }
}

</mosaic_0001>

<bundles_post_ra>
// kernel: tpu_custom_call.1
= control target key start
LH: loop header
LB: loop body
LE: loop exit
PB: predicated region body
PF: predicated region fallthrough
CT: control target
= control target key end

     0   :  { %8 = vsyncpa [#allocation3], 0  ;;  %s3300_s0 = inlined_call_operand.hbm [shape: f32[16,128], index: 0, kind: input, shape index: {}]   ;;  %s3301_s1 = inlined_call_operand.hbm [shape: f32[2,128,128], index: 1, kind: input, shape index: {}]   ;;  %s3302_s2 = inlined_call_operand.vmem [shape: f32[2,1,128], index: 2, kind: input, shape index: {}]   ;;  %s3303_s3 = inlined_call_operand.hbm [shape: f32[16,128], index: 3, kind: output, shape index: {}]  }
   0x1   :  { %9 = vsyncpa [#allocation6], 0 }
   0x2   :  { %10 = vsyncpa [#allocation4], 0  ;;  %s2656_s12 = smov [#allocation2]   ;;  %s2584_s16 = scalar_lea.hbm %s3300_s0, 256 }
   0x3   :  { %s16_s13 = sshll.u32 %s2656_s12, 4  ;;  %p2585_p0 = scmp.ne.s32.totalorder %s3300_s0, %s2584_s16  ;;  %s17_s13 = int_to_ptr.vmem [resolvable:$true] %s16_s13 }
   0x4   :  { %p2588_p1 = scmp.lt.u32.totalorder %s2584_s16, %s3300_s0 }
   0x6   :  { %p2590_p2 = pnand %p2588_p1, %p2585_p0 }
   0x8   :  { %2593 = shalt.err (!%p2590_p2)
}
   0x9   :  { %s2594_s21 = scalar_lea.vmem %s17_s13, 256  ;;  %p2599_p4 = scmp.lt.s32.totalorder %s17_s13, %s17_s13 }
   0xa   :  { %p2595_p3 = scmp.ne.s32.totalorder %s17_s13, %s2594_s21  ;;  %p2600_p5 = scmp.lt.s32.totalorder %s2594_s21, %s2594_s21 }
   0xc   :  { %p2601_p6 = por %p2600_p5, %p2599_p4 }
   0xe   :  { %p2602_p7 = pnand %p2601_p6, %p2595_p3 }
  0x10   :  { %2605 = shalt.err (!%p2602_p7)
}
  0x11   :  { %s2657_s22 = smov 128   ;;  %s2658_s23 = smov 8  }
  0x12   :  { %22 = dma.hbm_to_vmem [thread:$0]  %s3300_s0, 256, %s17_s13, [#allocation3], %s2657_s22, %s2657_s22, %s2658_s23  }
  0x13   :  { %s2659_s26 = smov [#allocation5]   ;;  %s2606_s30 = scalar_lea.hbm %s3301_s1, 4096 }
  0x14   :  { %s28_s27 = sshll.u32 %s2659_s26, 4  ;;  %p2607_p8 = scmp.ne.s32.totalorder %s3301_s1, %s2606_s30  ;;  %s29_s27 = int_to_ptr.vmem [resolvable:$true] %s28_s27 }
  0x15   :  { %p2610_p9 = scmp.lt.u32.totalorder %s2606_s30, %s3301_s1 }
  0x17   :  { %p2612_p10 = pnand %p2610_p9, %p2607_p8 }
  0x19   :  { %2615 = shalt.err (!%p2612_p10)
}
  0x1a   :  { %s2616_s8 = scalar_lea.vmem %s29_s27, 4096  ;;  %p2621_p12 = scmp.lt.s32.totalorder %s29_s27, %s29_s27 }
  0x1b   :  { %p2617_p11 = scmp.ne.s32.totalorder %s29_s27, %s2616_s8  ;;  %p2622_p13 = scmp.lt.s32.totalorder %s2616_s8, %s2616_s8 }
  0x1d   :  { %p2623_p0 = por %p2622_p13, %p2621_p12 }
  0x1f   :  { %p2624_p1 = pnand %p2623_p0, %p2617_p11 }
  0x21   :  { %2627 = shalt.err (!%p2624_p1)
}
  0x22   :  { %34 = dma.hbm_to_vmem [thread:$0]  %s3301_s1, 4096, %s29_s27, [#allocation6], %s2657_s22, %s2657_s22, %s2658_s23  }
  0x23   :  { %2650 = dma.done.wait [#allocation3], 256  }
  0x24   :  { %2651 = vsyncadd [#allocation3], 4294967040 }
  0x25   :  { %2652 = dma.done.wait [#allocation6], 4096  }
  0x26   :  { %2653 = vsyncadd [#allocation6], 4294963200  ;;  %v45_v0 = vld [vmem:[#allocation5] sm:$0xff]  ;;  %v46_v1 = vld [vmem:[#allocation5 + $0x8] sm:$0xff] }
  0x27   :  { %v47_v2 = vld [vmem:[#allocation5 + $0x10] sm:$0xff]  ;;  %v69_v3 = vand.u32 4294901760, %v45_v0  ;;  %v72_v4 = vand.u32 4294901760, %v46_v1  ;;  %v48_v5 = vld [vmem:[#allocation5 + $0x18] sm:$0xff]  ;;  %v49_v7 = vld [vmem:[#allocation5 + $0x20] sm:$0xff] }
  0x28   :  { %v75_v6 = vand.u32 4294901760, %v47_v2  ;;  %v50_v8 = vld [vmem:[#allocation5 + $0x28] sm:$0xff]  ;;  %v78_v9 = vand.u32 4294901760, %v48_v5  ;;  %v81_v11 = vand.u32 4294901760, %v49_v7  ;;  %v2715_v14 = vld [vmem:[#allocation5 + $0x30] sm:$0xff]  ;;  %v2717_v15 = vld [vmem:[#allocation5 + $0x38] sm:$0xff] }
  0x29   :  { %v2711_v10 = vpack.c.bf16 %v72_v4, %v69_v3  ;;  %v84_v12 = vand.u32 4294901760, %v50_v8  ;;  %v43_v16 = vld [vmem:[#allocation2] sm:$0xff]  ;;  %v87_v19 = vand.u32 4294901760, %v2715_v14  ;;  %v90_v20 = vand.u32 4294901760, %v2717_v15  ;;  %v53_v21 = vld [vmem:[#allocation5 + $0x40] sm:$0xff]  ;;  %v54_v22 = vld [vmem:[#allocation5 + $0x48] sm:$0xff] }
  0x2a   :  { %v2713_v13 = vpack.c.bf16 %v78_v9, %v75_v6  ;;  %v2721_v17 = vand.u32 4294901760, %v43_v16  ;;  %v2733_v25 = vsub.f32 %v45_v0, %v69_v3  ;;  %v93_v27 = vand.u32 4294901760, %v53_v21  ;;  %v44_v29 = vld [vmem:[#allocation2 + $0x8] sm:$0xff]  ;;  %v55_v30 = vld [vmem:[#allocation5 + $0x50] sm:$0xff]  ;;  %v57_v33 = vld [vmem:[#allocation5 + $0x60] sm:$0xff] }
  0x2b   :  { %2164 = vmatprep.subr.bf16.mxu0 %v2711_v10  ;;  %v2724_v18 = vpack.c.bf16 %v84_v12, %v81_v11  ;;  %v2736_v26 = vpack.c.bf16 %v90_v20, %v87_v19  ;;  %v96_v28 = vand.u32 4294901760, %v54_v22  ;;  %v56_v31 = vld [vmem:[#allocation5 + $0x58] sm:$0xff]  ;;  %v58_v34 = vld [vmem:[#allocation5 + $0x68] sm:$0xff]  ;;  %v59_v35 = vld [vmem:[#allocation5 + $0x70] sm:$0xff]  ;;  %v2741_v36 = vsub.f32 %v46_v1, %v72_v4 }
  0x2c   :  { %2166 = vmatpush3.bf16.msra.mxu0 %v2711_v10  ;;  %v2729_v23 = vsub.f32 %v43_v16, %v2721_v17  ;;  %v60_v37 = vld [vmem:[#allocation5 + $0x78] sm:$0xff]  ;;  %v172_v39 = vand.u32 4294901760, %v2733_v25  ;;  %v2745_v40 = vand.u32 4294901760, %v44_v29  ;;  %v2747_v41 = vsub.f32 %v47_v2, %v75_v6 }
  0x2d   :  { %2168 = vmatprep.subr.bf16.mxu0 %v2713_v13  ;;  %v2750_v42 = vpack.c.bf16 %v96_v28, %v93_v27  ;;  %v99_v43 = vand.u32 4294901760, %v55_v30  ;;  %v102_v44 = vand.u32 4294901760, %v56_v31  ;;  %v105_v45 = vand.u32 4294901760, %v57_v33 }
  0x2e   :  { %v151_v24 = vand.u32 4294901760, %v2729_v23  ;;  %v108_v46 = vand.u32 4294901760, %v58_v34  ;;  %v111_v47 = vand.u32 4294901760, %v59_v35  ;;  %v114_v48 = vand.u32 4294901760, %v60_v37 }
  0x2f   :  { %v179_v49 = vand.u32 4294901760, %v2741_v36  ;;  %v2753_v50 = vsub.f32 %v48_v5, %v78_v9  ;;  %v2755_v51 = vsub.f32 %v49_v7, %v81_v11  ;;  %v173_v52 = vsub.f32 %v2733_v25, %v172_v39 }
  0x30   :  { %2170 = vmatpush3.bf16.msra.mxu0 %v2713_v13  ;;  %v152_v32 = vsub.f32 %v2729_v23, %v151_v24  ;;  %v2760_v53 = vsub.f32 %v44_v29, %v2745_v40  ;;  %v186_v54 = vand.u32 4294901760, %v2747_v41  ;;  %v2763_v55 = vsub.f32 %v50_v8, %v84_v12 }
  0x31   :  { %2172 = vmatprep.subr.bf16.mxu0 %v2724_v18  ;;  %v2766_v56 = vpack.c.bf16 %v102_v44, %v99_v43  ;;  %v2768_v57 = vpack.c.bf16 %v108_v46, %v105_v45  ;;  %v2770_v58 = vpack.c.bf16 %v114_v48, %v111_v47  ;;  %v180_v59 = vsub.f32 %v2741_v36, %v179_v49 }
  0x32   :  { %v153_v38 = vand.u32 4294901760, %v152_v32  ;;  %v193_v60 = vand.u32 4294901760, %v2753_v50  ;;  %v200_v61 = vand.u32 4294901760, %v2755_v51  ;;  %v174_v62 = vand.u32 4294901760, %v173_v52 }
  0x33   :  { %v161_v63 = vand.u32 4294901760, %v2760_v53  ;;  %v187_v0 = vsub.f32 %v2747_v41, %v186_v54  ;;  %v207_v1 = vand.u32 4294901760, %v2763_v55  ;;  %v2781_v2 = vsub.f32 %v2715_v14, %v87_v19 }
  0x34   :  { %2174 = vmatpush3.bf16.msra.mxu0 %v2724_v18  ;;  %1775 = vmatprep.mubr.f32.mxu0 %v153_v38  ;;  %v2784_v3 = vsub.f32 %v2717_v15, %v90_v20  ;;  %v2786_v4 = vsub.f32 %v53_v21, %v93_v27  ;;  %v2788_v5 = vsub.f32 %v54_v22, %v96_v28  ;;  %v181_v11 = vand.u32 4294901760, %v180_v59 }
  0x35   :  { %2176 = vmatprep.subr.bf16.mxu0 %v2736_v26  ;;  %v2790_v6 = vsub.f32 %v55_v30, %v99_v43  ;;  %v2792_v7 = vsub.f32 %v56_v31, %v102_v44  ;;  %v2794_v8 = vsub.f32 %v57_v33, %v105_v45  ;;  %v2796_v9 = vsub.f32 %v58_v34, %v108_v46 }
  0x36   :  { %v194_v12 = vsub.f32 %v2753_v50, %v193_v60  ;;  %v2799_v14 = vsub.f32 %v59_v35, %v111_v47  ;;  %v2801_v16 = vsub.f32 %v60_v37, %v114_v48  ;;  %v162_v15 = vsub.f32 %v2760_v53, %v161_v63 }
  0x37   :  { %v188_v19 = vand.u32 4294901760, %v187_v0  ;;  %v201_v20 = vsub.f32 %v2755_v51, %v200_v61  ;;  %v208_v21 = vsub.f32 %v2763_v55, %v207_v1  ;;  %v214_v22 = vand.u32 4294901760, %v2781_v2 }
  0x38   :  { %2178 = vmatpush3.bf16.msra.mxu0 %v2736_v26  ;;  %v221_v27 = vand.u32 4294901760, %v2784_v3  ;;  %v228_v28 = vand.u32 4294901760, %v2786_v4  ;;  %v235_v29 = vand.u32 4294901760, %v2788_v5  ;;  %v242_v30 = vand.u32 4294901760, %v2790_v6 }
  0x39   :  { %2180 = vmatprep.subr.bf16.mxu0 %v2750_v42  ;;  %v249_v31 = vand.u32 4294901760, %v2792_v7  ;;  %v256_v32 = vand.u32 4294901760, %v2794_v8  ;;  %v263_v33 = vand.u32 4294901760, %v2796_v9  ;;  %v270_v34 = vand.u32 4294901760, %v2799_v14 }
  0x3a   :  { %v277_v35 = vand.u32 4294901760, %v2801_v16  ;;  %v2820_v37 = vpack.c.bf16 %v179_v49, %v172_v39  ;;  %v2822_v38 = vpack.c.bf16 %v193_v60, %v186_v54  ;;  %v2195_v43 = vpack.c.bf16 %v181_v11, %v174_v62 }
  0x3b   :  { %v2825_v44 = vpack.c.bf16 %v207_v1, %v200_v61  ;;  %v2827_v45 = vpack.c.bf16 %v221_v27, %v214_v22  ;;  %v2829_v46 = vpack.c.bf16 %v235_v29, %v228_v28  ;;  %v195_v47 = vand.u32 4294901760, %v194_v12 }
  0x3c   :  { %2182 = vmatpush3.bf16.msra.mxu0 %v2750_v42  ;;  %v2832_v48 = vpack.c.bf16 %v249_v31, %v242_v30  ;;  %v2834_v52 = vpack.c.bf16 %v263_v33, %v256_v32  ;;  %v2836_v39 = vpack.c.bf16 %v277_v35, %v270_v34  ;;  %v163_v49 = vand.u32 4294901760, %v162_v15 }
  0x3d   :  { %2184 = vmatprep.subr.bf16.mxu0 %v2766_v56  ;;  %v202_v54 = vand.u32 4294901760, %v201_v20  ;;  %v209_v59 = vand.u32 4294901760, %v208_v21  ;;  %v2199_v60 = vpack.c.bf16 %v195_v47, %v188_v19  ;;  %v215_v61 = vsub.f32 %v2781_v2, %v214_v22 }
  0x3e   :  { %v222_v62 = vsub.f32 %v2784_v3, %v221_v27  ;;  %v229_v12 = vsub.f32 %v2786_v4, %v228_v28  ;;  %v236_v15 = vsub.f32 %v2788_v5, %v235_v29  ;;  %v243_v20 = vsub.f32 %v2790_v6, %v242_v30 }
  0x3f   :  { %v2203_v0 = vpack.c.bf16 %v209_v59, %v202_v54  ;;  %v216_v1 = vand.u32 4294901760, %v215_v61  ;;  %v250_v27 = vsub.f32 %v2792_v7, %v249_v31  ;;  %v264_v28 = vsub.f32 %v2796_v9, %v263_v33 }
  0x40   :  { %2186 = vmatpush3.bf16.msra.mxu0 %v2766_v56  ;;  %v223_v11 = vand.u32 4294901760, %v222_v62  ;;  %v230_v21 = vand.u32 4294901760, %v229_v12  ;;  %v237_v22 = vand.u32 4294901760, %v236_v15  ;;  %v278_v61 = vsub.f32 %v2801_v16, %v277_v35  ;;  %v2855_v35 = vld [vmem:[#allocation5 + $0x80] sm:$0xff] }
  0x41   :  { %2188 = vmatprep.subr.bf16.mxu0 %v2768_v57  ;;  %v251_v54 = vand.u32 4294901760, %v250_v27  ;;  %v265_v30 = vand.u32 4294901760, %v264_v28  ;;  %v2227_v33 = vpack.c.bf16 %v2741_v36, %v2733_v25  ;;  %v778_v12 = vand.u32 4294901760, %v2855_v35  ;;  %v2864_v36 = vld [vmem:[#allocation5 + $0x98] sm:$0xff] }
  0x42   :  { %v2207_v19 = vpack.c.bf16 %v223_v11, %v216_v1  ;;  %v2211_v47 = vpack.c.bf16 %v237_v22, %v230_v21  ;;  %v2857_v1 = vld [vmem:[#allocation5 + $0x88] sm:$0xff]  ;;  %v2859_v11 = vld [vmem:[#allocation5 + $0x90] sm:$0xff] }
  0x43   :  { %v781_v25 = vand.u32 4294901760, %v2857_v1  ;;  %v784_v15 = vand.u32 4294901760, %v2859_v11 }
  0x44   :  { %2190 = vmatpush3.bf16.msra.mxu0 %v2768_v57 }
  0x45   :  { %2192 = vmatprep.subr.bf16.mxu0 %v2770_v58  ;;  %v2878_v21 = vpack.c.bf16 %v781_v25, %v778_v12 }
  0x47   :  { %2356 = vmatprep.subr.bf16.mxu1 %v2878_v21 }
  0x48   :  { %2194 = vmatpush3.bf16.msra.mxu0 %v2770_v58  ;;  %2358 = vmatpush3.bf16.msra.mxu1 %v2878_v21 }
  0x49   :  { %2196 = vmatprep.subr.bf16.mxu0 %v2195_v43 }
  0x4b   :  { %1776 = vmatmul.mubr.f32.vlgmr.msra.gmra.mrb[0].mxu0 %v163_v49  ;;  %v244_v49 = vand.u32 4294901760, %v243_v20  ;;  %v2235_v20 = vpack.c.bf16 %v2763_v55, %v2755_v51  ;;  %v2890_v51 = vld [vmem:[#allocation5 + $0xb8] sm:$0xff]  ;;  %v2239_v55 = vpack.c.bf16 %v2784_v3, %v2781_v2  ;;  %v2243_v2 = vpack.c.bf16 %v2788_v5, %v2786_v4 }
  0x4c   :  { %2198 = vmatpush3.bf16.msra.mxu0 %v2195_v43  ;;  %1810 = vmatprep.mubr.f32.mxu0 %v2721_v17  ;;  %v257_v43 = vsub.f32 %v2794_v8, %v256_v32  ;;  %v279_v32 = vand.u32 4294901760, %v278_v61  ;;  %v799_v28 = vand.u32 4294901760, %v2890_v51  ;;  %v2247_v61 = vpack.c.bf16 %v2792_v7, %v2790_v6 }
  0x4d   :  { %2200 = vmatprep.subr.bf16.mxu0 %v2199_v60  ;;  %v2215_v59 = vpack.c.bf16 %v251_v54, %v244_v49  ;;  %v2251_v5 = vpack.c.bf16 %v2796_v9, %v2794_v8  ;;  %v2255_v6 = vpack.c.bf16 %v2801_v16, %v2799_v14 }
  0x4e   :  { %v258_v29 = vand.u32 4294901760, %v257_v43 }
  0x50   :  { %2202 = vmatpush3.bf16.msra.mxu0 %v2199_v60  ;;  %v271_v60 = vsub.f32 %v2799_v14, %v270_v34  ;;  %v2219_v31 = vpack.c.bf16 %v265_v30, %v258_v29  ;;  %v2231_v34 = vpack.c.bf16 %v2753_v50, %v2747_v41  ;;  %v2867_v41 = vld [vmem:[#allocation5 + $0xa0] sm:$0xff]  ;;  %v2869_v50 = vld [vmem:[#allocation5 + $0xa8] sm:$0xff] }
  0x51   :  { %2204 = vmatprep.subr.bf16.mxu0 %v2203_v0  ;;  %v790_v22 = vand.u32 4294901760, %v2867_v41  ;;  %v793_v27 = vand.u32 4294901760, %v2869_v50  ;;  %v2905_v29 = vld [vmem:[#allocation5 + $0xc0] sm:$0xff] }
  0x52   :  { %v272_v62 = vand.u32 4294901760, %v271_v60  ;;  %v802_v30 = vand.u32 4294901760, %v2905_v29 }
  0x53   :  { %v2901_v49 = vpack.c.bf16 %v793_v27, %v790_v22 }
  0x54   :  { %2206 = vmatpush3.bf16.msra.mxu0 %v2203_v0  ;;  %v2223_v0 = vpack.c.bf16 %v279_v32, %v272_v62 }
  0x55   :  { %2208 = vmatprep.subr.bf16.mxu0 %v2207_v19 }
  0x58   :  { %2210 = vmatpush3.bf16.msra.mxu0 %v2207_v19  ;;  %v787_v19 = vand.u32 4294901760, %v2864_v36 }
  0x59   :  { %2212 = vmatprep.subr.bf16.mxu0 %v2211_v47 }
  0x5a   :  { %v2886_v43 = vpack.c.bf16 %v787_v19, %v784_v15 }
  0x5c   :  { %2214 = vmatpush3.bf16.msra.mxu0 %v2211_v47  ;;  %v2888_v47 = vld [vmem:[#allocation5 + $0xb0] sm:$0xff]  ;;  %2360 = vmatprep.subr.bf16.mxu1 %v2886_v43 }
  0x5d   :  { %2216 = vmatprep.subr.bf16.mxu0 %v2215_v59  ;;  %v796_v54 = vand.u32 4294901760, %v2888_v47  ;;  %2362 = vmatpush3.bf16.msra.mxu1 %v2886_v43 }
  0x5e   :  { %2364 = vmatprep.subr.bf16.mxu1 %v2901_v49 }
  0x5f   :  { %v2917_v3 = vpack.c.bf16 %v799_v28, %v796_v54 }
  0x60   :  { %2218 = vmatpush3.bf16.msra.mxu0 %v2215_v59  ;;  %v2907_v59 = vld [vmem:[#allocation5 + $0xc8] sm:$0xff] }
  0x61   :  { %2220 = vmatprep.subr.bf16.mxu0 %v2219_v31  ;;  %v805_v60 = vand.u32 4294901760, %v2907_v59  ;;  %2366 = vmatpush3.bf16.msra.mxu1 %v2901_v49 }
  0x62   :  { %2368 = vmatprep.subr.bf16.mxu1 %v2917_v3 }
  0x63   :  { %v2929_v4 = vpack.c.bf16 %v805_v60, %v802_v30 }
  0x64   :  { %2222 = vmatpush3.bf16.msra.mxu0 %v2219_v31 }
  0x65   :  { %2224 = vmatprep.subr.bf16.mxu0 %v2223_v0  ;;  %2370 = vmatpush3.bf16.msra.mxu1 %v2917_v3 }
  0x66   :  { %2372 = vmatprep.subr.bf16.mxu1 %v2929_v4 }
  0x68   :  { %2226 = vmatpush3.bf16.msra.mxu0 %v2223_v0 }
  0x69   :  { %2228 = vmatprep.subr.bf16.mxu0 %v2227_v33  ;;  %2374 = vmatpush3.bf16.msra.mxu1 %v2929_v4 }
  0x6b   :  { %1811 = vmatmul.mubr.f32.vlgmr.msra.gmra.mrb[0].mxu0 %v2745_v40 }
  0x6c   :  { %2230 = vmatpush3.bf16.msra.mxu0 %v2227_v33  ;;  %1845 = vmatprep.mubr.f32.mxu0 %v2729_v23 }
  0x6d   :  { %2232 = vmatprep.subr.bf16.mxu0 %v2231_v34 }
  0x70   :  { %2234 = vmatpush3.bf16.msra.mxu0 %v2231_v34 }
  0x71   :  { %2236 = vmatprep.subr.bf16.mxu0 %v2235_v20 }
  0x74   :  { %2238 = vmatpush3.bf16.msra.mxu0 %v2235_v20 }
  0x75   :  { %2240 = vmatprep.subr.bf16.mxu0 %v2239_v55 }
  0x78   :  { %2242 = vmatpush3.bf16.msra.mxu0 %v2239_v55 }
  0x79   :  { %2244 = vmatprep.subr.bf16.mxu0 %v2243_v2 }
  0x7c   :  { %2246 = vmatpush3.bf16.msra.mxu0 %v2243_v2 }
  0x7d   :  { %2248 = vmatprep.subr.bf16.mxu0 %v2247_v61 }
  0x80   :  { %2250 = vmatpush3.bf16.msra.mxu0 %v2247_v61 }
  0x81   :  { %2252 = vmatprep.subr.bf16.mxu0 %v2251_v5 }
  0x84   :  { %2254 = vmatpush3.bf16.msra.mxu0 %v2251_v5 }
  0x85   :  { %2256 = vmatprep.subr.bf16.mxu0 %v2255_v6 }
  0x88   :  { %2258 = vmatpush3.bf16.msra.mxu0 %v2255_v6 }
  0x89   :  { %2260 = vmatprep.subr.bf16.mxu0 %v2711_v10 }
  0x8b   :  { %1846 = vmatmul.mubr.f32.vlgmr.msra.gmra.mrb[0].mxu0 %v2760_v53 }
  0x8c   :  { %2262 = vmatpush3.bf16.msra.mxu0 %v2711_v10  ;;  %1880 = vmatprep.mubr.f32.mxu0 %v151_v24  ;;  %v765_v24 = vld [vmem:[#allocation5 + $0xe0] sm:$0xff] }
  0x8d   :  { %2264 = vmatprep.subr.bf16.mxu0 %v2713_v13 }
  0x90   :  { %2266 = vmatpush3.bf16.msra.mxu0 %v2713_v13 }
  0x91   :  { %2268 = vmatprep.subr.bf16.mxu0 %v2724_v18 }
  0x94   :  { %2270 = vmatpush3.bf16.msra.mxu0 %v2724_v18 }
  0x95   :  { %2272 = vmatprep.subr.bf16.mxu0 %v2736_v26 }
  0x98   :  { %2274 = vmatpush3.bf16.msra.mxu0 %v2736_v26 }
  0x99   :  { %2276 = vmatprep.subr.bf16.mxu0 %v2750_v42 }
  0x9c   :  { %2278 = vmatpush3.bf16.msra.mxu0 %v2750_v42 }
  0x9d   :  { %2280 = vmatprep.subr.bf16.mxu0 %v2766_v56 }
  0xa0   :  { %2282 = vmatpush3.bf16.msra.mxu0 %v2766_v56 }
  0xa1   :  { %2284 = vmatprep.subr.bf16.mxu0 %v2768_v57 }
  0xa4   :  { %2286 = vmatpush3.bf16.msra.mxu0 %v2768_v57 }
  0xa5   :  { %2288 = vmatprep.subr.bf16.mxu0 %v2770_v58 }
  0xa8   :  { %2290 = vmatpush3.bf16.msra.mxu0 %v2770_v58 }
  0xa9   :  { %2292 = vmatprep.subr.bf16.mxu0 %v2820_v37 }
  0xab   :  { %1881 = vmatmul.mubr.f32.vlgmr.msra.gmra.mrb[0].mxu0 %v161_v63  ;;  %v768_v63 = vld [vmem:[#allocation5 + $0xf8] sm:$0xff] }
  0xac   :  { %2294 = vmatpush3.bf16.msra.mxu0 %v2820_v37  ;;  %1915 = vmatprep.mubr.f32.mxu0 %v2721_v17  ;;  %v823_v8 = vand.u32 4294901760, %v768_v63 }
  0xad   :  { %2296 = vmatprep.subr.bf16.mxu0 %v2822_v38 }
  0xae   :  { %v3053_v2 = vsub.f32 %v768_v63, %v823_v8 }
  0xb0   :  { %2298 = vmatpush3.bf16.msra.mxu0 %v2822_v38 }
  0xb1   :  { %2300 = vmatprep.subr.bf16.mxu0 %v2825_v44 }
  0xb4   :  { %2302 = vmatpush3.bf16.msra.mxu0 %v2825_v44 }
  0xb5   :  { %2304 = vmatprep.subr.bf16.mxu0 %v2827_v45 }
  0xb8   :  { %2306 = vmatpush3.bf16.msra.mxu0 %v2827_v45 }
  0xb9   :  { %2308 = vmatprep.subr.bf16.mxu0 %v2829_v46 }
  0xbc   :  { %2310 = vmatpush3.bf16.msra.mxu0 %v2829_v46 }
  0xbd   :  { %2312 = vmatprep.subr.bf16.mxu0 %v2832_v48 }
  0xc0   :  { %2314 = vmatpush3.bf16.msra.mxu0 %v2832_v48 }
  0xc1   :  { %2316 = vmatprep.subr.bf16.mxu0 %v2834_v52 }
  0xc4   :  { %2318 = vmatpush3.bf16.msra.mxu0 %v2834_v52 }
  0xc5   :  { %2320 = vmatprep.subr.bf16.mxu0 %v2836_v39 }
  0xc8   :  { %2322 = vmatpush3.bf16.msra.mxu0 %v2836_v39 }
  0xc9   :  { %2324 = vmatprep.subr.bf16.mxu0 %v2711_v10 }
  0xcb   :  { %1916 = vmatmul.mubr.f32.vlgmr.msra.gmra.mrb[0].mxu0 %v2745_v40 }
  0xcc   :  { %2326 = vmatpush3.bf16.msra.mxu0 %v2711_v10  ;;  %1950 = vmatprep.mubr.f32.mxu0 %v2721_v17  ;;  %v763_v10 = vld [vmem:[#allocation5 + $0xd0] sm:$0xff] }
  0xcd   :  { %2328 = vmatprep.subr.bf16.mxu0 %v2713_v13  ;;  %v808_v17 = vand.u32 4294901760, %v763_v10 }
  0xcf   :  { %v3028_v48 = vsub.f32 %v763_v10, %v808_v17  ;;  %v3304_v10 = vand.u32 4294901760, %v3053_v2 }
  0xd0   :  { %2330 = vmatpush3.bf16.msra.mxu0 %v2713_v13  ;;  %v764_v13 = vld [vmem:[#allocation5 + $0xd8] sm:$0xff] }
  0xd1   :  { %2332 = vmatprep.subr.bf16.mxu0 %v2724_v18  ;;  %v951_v39 = vand.u32 4294901760, %v3028_v48 }
  0xd3   :  { %v952_v62 = vsub.f32 %v3028_v48, %v951_v39 }
  0xd4   :  { %2334 = vmatpush3.bf16.msra.mxu0 %v2724_v18  ;;  %v811_v18 = vand.u32 4294901760, %v764_v13 }
  0xd5   :  { %2336 = vmatprep.subr.bf16.mxu0 %v2736_v26  ;;  %v953_v34 = vand.u32 4294901760, %v952_v62 }
  0xd6   :  { %v2995_v23 = vpack.c.bf16 %v811_v18, %v808_v17  ;;  %v3030_v52 = vsub.f32 %v764_v13, %v811_v18  ;;  %v987_v18 = vsub.f32 %v3053_v2, %v3304_v10 }
  0xd8   :  { %2338 = vmatpush3.bf16.msra.mxu0 %v2736_v26  ;;  %v766_v26 = vld [vmem:[#allocation5 + $0xe8] sm:$0xff]  ;;  %2376 = vmatprep.subr.bf16.mxu1 %v2995_v23  ;;  %v958_v31 = vand.u32 4294901760, %v3030_v52  ;;  %v3076_v63 = vpack.c.bf16 %v3030_v52, %v3028_v48 }
  0xd9   :  { %2340 = vmatprep.subr.bf16.mxu0 %v2750_v42  ;;  %v817_v53 = vand.u32 4294901760, %v766_v26  ;;  %2378 = vmatpush3.bf16.msra.mxu1 %v2995_v23 }
  0xda   :  { %v959_v32 = vsub.f32 %v3030_v52, %v958_v31 }
  0xdb   :  { %v3042_v33 = vsub.f32 %v766_v26, %v817_v53 }
  0xdc   :  { %2342 = vmatpush3.bf16.msra.mxu0 %v2750_v42  ;;  %v814_v42 = vand.u32 4294901760, %v765_v24 }
  0xdd   :  { %2344 = vmatprep.subr.bf16.mxu0 %v2766_v56 }
  0xde   :  { %v3040_v0 = vsub.f32 %v765_v24, %v814_v42 }
  0xe0   :  { %2346 = vmatpush3.bf16.msra.mxu0 %v2766_v56  ;;  %v2999_v56 = vpack.c.bf16 %v817_v53, %v814_v42  ;;  %v988_v42 = vand.u32 4294901760, %v987_v18 }
  0xe1   :  { %2348 = vmatprep.subr.bf16.mxu0 %v2768_v57 }
  0xe2   :  { %2380 = vmatprep.subr.bf16.mxu1 %v2999_v56 }
  0xe3   :  { %2382 = vmatpush3.bf16.msra.mxu1 %v2999_v56 }
  0xe4   :  { %2350 = vmatpush3.bf16.msra.mxu0 %v2768_v57  ;;  %v3009_v57 = vsub.f32 %v2857_v1, %v781_v25  ;;  %v3307_v1 = vand.u32 4294901760, %v3040_v0 }
  0xe5   :  { %2352 = vmatprep.subr.bf16.mxu0 %v2770_v58 }
  0xe6   :  { %v888_v14 = vand.u32 4294901760, %v3009_v57  ;;  %v966_v20 = vsub.f32 %v3040_v0, %v3307_v1 }
  0xe8   :  { %2354 = vmatpush3.bf16.msra.mxu0 %v2770_v58  ;;  %v767_v58 = vld [vmem:[#allocation5 + $0xf0] sm:$0xff]  ;;  %v889_v38 = vsub.f32 %v3009_v57, %v888_v14  ;;  %v967_v5 = vand.u32 4294901760, %v966_v20 }
  0xe9   :  { %v820_v7 = vand.u32 4294901760, %v767_v58 }
  0xea   :  { %v890_v45 = vand.u32 4294901760, %v889_v38  ;;  %v3094_v38 = vsub.f32 %v2864_v36, %v787_v19 }
  0xeb   :  { %1951 = vmatmul.mubr.f32.vlgmr.msra.gmra.mrb[0].mxu0 %v2745_v40  ;;  %v3004_v40 = vsub.f32 %v2855_v35, %v778_v12  ;;  %v3015_v16 = vpack.c.bf16 %v823_v8, %v820_v7  ;;  %v960_v35 = vand.u32 4294901760, %v959_v32  ;;  %v3306_v12 = vand.u32 4294901760, %v3042_v33 }
  0xec   :  { %v3051_v55 = vsub.f32 %v767_v58, %v820_v7  ;;  %v3080_v7 = vpack.c.bf16 %v3042_v33, %v3040_v0  ;;  %v902_v62 = vand.u32 4294901760, %v3094_v38 }
  0xed   :  { %v881_v9 = vand.u32 4294901760, %v3004_v40  ;;  %2384 = vmatprep.subr.bf16.mxu1 %v3015_v16  ;;  %v3046_v25 = vpack.c.bf16 %v960_v35, %v953_v34  ;;  %v973_v61 = vsub.f32 %v3042_v33, %v3306_v12  ;;  %v3072_v58 = vpack.c.bf16 %v3009_v57, %v3004_v40 }
  0xee   :  { %2386 = vmatpush3.bf16.msra.mxu1 %v3015_v16  ;;  %v3305_v6 = vand.u32 4294901760, %v3051_v55  ;;  %v3084_v8 = vpack.c.bf16 %v3053_v2, %v3051_v55  ;;  %v3104_v34 = vsub.f32 %v2867_v41, %v790_v22 }
  0xef   :  { %v882_v37 = vsub.f32 %v3004_v40, %v881_v9  ;;  %v974_v13 = vand.u32 4294901760, %v973_v61  ;;  %v903_v61 = vsub.f32 %v3094_v38, %v902_v62 }
  0xf0   :  { %v980_v17 = vsub.f32 %v3051_v55, %v3305_v6  ;;  %v909_v22 = vand.u32 4294901760, %v3104_v34 }
  0xf1   :  { %v883_v44 = vand.u32 4294901760, %v882_v37  ;;  %v3066_v24 = vpack.c.bf16 %v974_v13, %v967_v5  ;;  %v3089_v37 = vsub.f32 %v2859_v11, %v784_v15  ;;  %v3109_v11 = vsub.f32 %v2869_v50, %v793_v27 }
  0xf2   :  { %v981_v26 = vand.u32 4294901760, %v980_v17  ;;  %v3126_v27 = vsub.f32 %v2888_v47, %v796_v54  ;;  %v3134_v13 = vsub.f32 %v2890_v51, %v799_v28  ;;  %v910_v47 = vsub.f32 %v3104_v34, %v909_v22 }
  0xf3   :  { %v3025_v46 = vpack.c.bf16 %v890_v45, %v883_v44  ;;  %v1524_v44 = vld [vmem:[%s3302_s2] ss:$0 sm:$0xff]  ;;  %v895_v45 = vand.u32 4294901760, %v3089_v37  ;;  %v916_v50 = vand.u32 4294901760, %v3109_v11 }
  0xf4   :  { %v3068_v53 = vpack.c.bf16 %v988_v42, %v981_v26  ;;  %v904_v42 = vand.u32 4294901760, %v903_v61  ;;  %v923_v51 = vand.u32 4294901760, %v3126_v27  ;;  %v911_v10 = vand.u32 4294901760, %v910_v47 }
  0xf5   :  { %2388 = vmatprep.subr.bf16.mxu1 %v3025_v46  ;;  %v896_v20 = vsub.f32 %v3089_v37, %v895_v45  ;;  %v917_v54 = vsub.f32 %v3109_v11, %v916_v50  ;;  %v2491_v40 = vpack.c.bf16 %v916_v50, %v909_v22 }
  0xf6   :  { %v924_v12 = vsub.f32 %v3126_v27, %v923_v51 }
  0xf7   :  { %v897_v26 = vand.u32 4294901760, %v896_v20  ;;  %v918_v6 = vand.u32 4294901760, %v917_v54 }
  0xf9   :  { %v2391_v20 = vpack.c.bf16 %v904_v42, %v897_v26  ;;  %v925_v26 = vand.u32 4294901760, %v924_v12  ;;  %v2423_v12 = vpack.c.bf16 %v3094_v38, %v3089_v37  ;;  %v3311_v37 = vand.u32 4294901760, %v3053_v2 }
 0x1be   :  { %v1952_v32 = vpop.f32.mrb[0].mxu0 }
 0x1bf   :  { %v2547_v36 = vadd.f32 %v1952_v32, %v1524_v44  ;;  %v742_v15 = vpop.f32.mrb[1].mxu0  ;;  %v930_v32 = vand.u32 4294901760, %v3134_v13 }
 0x1c0   :  { %v2548_v19 = vadd.f32 %v1524_v44, %v742_v15  ;;  %v3160_v15 = vsub.f32 %v2907_v59, %v805_v60  ;;  %v2395_v60 = vpack.c.bf16 %v918_v6, %v911_v10  ;;  %v2431_v6 = vpack.c.bf16 %v3134_v13, %v3126_v27 }
 0x1c1   :  { %v3111_v35 = vand.u32 4294901760, %v2547_v36  ;;  %v2495_v57 = vpack.c.bf16 %v930_v32, %v923_v51 }
 0x1c2   :  { %v3119_v41 = vand.u32 4294901760, %v2548_v19 }
 0x1c3   :  { %v3129_v5 = vsub.f32 %v2547_v36, %v3111_v35  ;;  %v3155_v36 = vsub.f32 %v2905_v29, %v802_v30  ;;  %v931_v29 = vsub.f32 %v3134_v13, %v930_v32  ;;  %v944_v30 = vand.u32 4294901760, %v3160_v15 }
 0x1c4   :  { %v3137_v17 = vsub.f32 %v2548_v19, %v3119_v41 }
 0x1c5   :  { %v870_v18 = vand.u32 4294901760, %v3129_v5  ;;  %v937_v59 = vand.u32 4294901760, %v3155_v36  ;;  %v932_v42 = vand.u32 4294901760, %v931_v29  ;;  %v945_v54 = vsub.f32 %v3160_v15, %v944_v30 }
 0x1c6   :  { %v860_v44 = vand.u32 4294901760, %v3137_v17  ;;  %v2435_v10 = vpack.c.bf16 %v3160_v15, %v3155_v36 }
 0x1c7   :  { %v871_v28 = vsub.f32 %v3129_v5, %v870_v18  ;;  %v938_v47 = vsub.f32 %v3155_v36, %v937_v59 }
 0x1c8   :  { %v861_v19 = vsub.f32 %v3137_v17, %v860_v44 }
 0x1c9   :  { %v872_v1 = vand.u32 4294901760, %v871_v28  ;;  %v2399_v28 = vpack.c.bf16 %v932_v42, %v925_v26 }
 0x1ca   :  { %v862_v61 = vand.u32 4294901760, %v861_v19  ;;  %v946_v19 = vand.u32 4294901760, %v945_v54 }
 0x1cc   :  { %1985 = vmatprep.mubr.f32.mxu1 %v862_v61 }
 0x1cd   :  { %1986 = vmatmul.mubr.f32.vlgmr.msra.gmra.mrb[0].mxu1 %v872_v1  ;;  %v939_v1 = vand.u32 4294901760, %v938_v47 }
 0x1ce   :  { %2390 = vmatpush3.bf16.msra.mxu1 %v3025_v46  ;;  %2020 = vmatprep.mubr.f32.mxu1 %v3119_v41 }
 0x1cf   :  { %2392 = vmatprep.subr.bf16.mxu1 %v2391_v20  ;;  %v2403_v46 = vpack.c.bf16 %v946_v19, %v939_v1 }
 0x1d2   :  { %2394 = vmatpush3.bf16.msra.mxu1 %v2391_v20 }
 0x1d3   :  { %2396 = vmatprep.subr.bf16.mxu1 %v2395_v60 }
 0x1d6   :  { %2398 = vmatpush3.bf16.msra.mxu1 %v2395_v60 }
 0x1d7   :  { %2400 = vmatprep.subr.bf16.mxu1 %v2399_v28 }
 0x1da   :  { %2402 = vmatpush3.bf16.msra.mxu1 %v2399_v28 }
 0x1db   :  { %2404 = vmatprep.subr.bf16.mxu1 %v2403_v46 }
 0x1de   :  { %2406 = vmatpush3.bf16.msra.mxu1 %v2403_v46 }
 0x1df   :  { %2408 = vmatprep.subr.bf16.mxu1 %v3046_v25 }
 0x1e2   :  { %2410 = vmatpush3.bf16.msra.mxu1 %v3046_v25  ;;  %v2427_v25 = vpack.c.bf16 %v3109_v11, %v3104_v34 }
 0x1e3   :  { %2412 = vmatprep.subr.bf16.mxu1 %v3066_v24 }
 0x1e6   :  { %2414 = vmatpush3.bf16.msra.mxu1 %v3066_v24  ;;  %v2483_v24 = vpack.c.bf16 %v888_v14, %v881_v9  ;;  %v2499_v9 = vpack.c.bf16 %v944_v30, %v937_v59  ;;  %v2503_v14 = vpack.c.bf16 %v958_v31, %v951_v39 }
 0x1e7   :  { %2416 = vmatprep.subr.bf16.mxu1 %v3068_v53 }
 0x1ea   :  { %2418 = vmatpush3.bf16.msra.mxu1 %v3068_v53  ;;  %v2487_v53 = vpack.c.bf16 %v902_v62, %v895_v45 }
 0x1eb   :  { %2420 = vmatprep.subr.bf16.mxu1 %v3072_v58 }
 0x1ed   :  { %2021 = vmatmul.mubr.f32.vlgmr.msra.gmra.mrb[0].mxu1 %v3111_v35 }
 0x1ee   :  { %2422 = vmatpush3.bf16.msra.mxu1 %v3072_v58  ;;  %2055 = vmatprep.mubr.f32.mxu1 %v3137_v17  ;;  %v3308_v58 = vand.u32 4294901760, %v3040_v0 }
 0x1ef   :  { %2424 = vmatprep.subr.bf16.mxu1 %v2423_v12 }
 0x1f2   :  { %2426 = vmatpush3.bf16.msra.mxu1 %v2423_v12 }
 0x1f3   :  { %2428 = vmatprep.subr.bf16.mxu1 %v2427_v25 }
 0x1f6   :  { %2430 = vmatpush3.bf16.msra.mxu1 %v2427_v25 }
 0x1f7   :  { %2432 = vmatprep.subr.bf16.mxu1 %v2431_v6 }
 0x1fa   :  { %2434 = vmatpush3.bf16.msra.mxu1 %v2431_v6 }
 0x1fb   :  { %2436 = vmatprep.subr.bf16.mxu1 %v2435_v10 }
 0x1fe   :  { %2438 = vmatpush3.bf16.msra.mxu1 %v2435_v10 }
 0x1ff   :  { %2440 = vmatprep.subr.bf16.mxu1 %v3076_v63 }
 0x202   :  { %2442 = vmatpush3.bf16.msra.mxu1 %v3076_v63  ;;  %v3309_v63 = vand.u32 4294901760, %v3042_v33 }
 0x203   :  { %2444 = vmatprep.subr.bf16.mxu1 %v3080_v7 }
 0x206   :  { %2446 = vmatpush3.bf16.msra.mxu1 %v3080_v7  ;;  %v2507_v7 = vpack.c.bf16 %v3309_v63, %v3308_v58 }
 0x207   :  { %2448 = vmatprep.subr.bf16.mxu1 %v3084_v8 }
 0x20a   :  { %2450 = vmatpush3.bf16.msra.mxu1 %v3084_v8  ;;  %v3310_v8 = vand.u32 4294901760, %v3051_v55 }
 0x20b   :  { %2452 = vmatprep.subr.bf16.mxu1 %v2878_v21 }
 0x20c   :  { %v2511_v38 = vpack.c.bf16 %v3311_v37, %v3310_v8 }
 0x20d   :  { %2056 = vmatmul.mubr.f32.vlgmr.msra.gmra.mrb[0].mxu1 %v3129_v5 }
 0x20e   :  { %2454 = vmatpush3.bf16.msra.mxu1 %v2878_v21  ;;  %2090 = vmatprep.mubr.f32.mxu1 %v860_v44 }
 0x20f   :  { %2456 = vmatprep.subr.bf16.mxu1 %v2886_v43 }
 0x212   :  { %2458 = vmatpush3.bf16.msra.mxu1 %v2886_v43 }
 0x213   :  { %2460 = vmatprep.subr.bf16.mxu1 %v2901_v49 }
 0x216   :  { %2462 = vmatpush3.bf16.msra.mxu1 %v2901_v49 }
 0x217   :  { %2464 = vmatprep.subr.bf16.mxu1 %v2917_v3 }
 0x21a   :  { %2466 = vmatpush3.bf16.msra.mxu1 %v2917_v3 }
 0x21b   :  { %2468 = vmatprep.subr.bf16.mxu1 %v2929_v4 }
 0x21e   :  { %2470 = vmatpush3.bf16.msra.mxu1 %v2929_v4 }
 0x21f   :  { %2472 = vmatprep.subr.bf16.mxu1 %v2995_v23 }
 0x222   :  { %2474 = vmatpush3.bf16.msra.mxu1 %v2995_v23 }
 0x223   :  { %2476 = vmatprep.subr.bf16.mxu1 %v2999_v56 }
 0x226   :  { %2478 = vmatpush3.bf16.msra.mxu1 %v2999_v56 }
 0x227   :  { %2480 = vmatprep.subr.bf16.mxu1 %v3015_v16 }
 0x22a   :  { %2482 = vmatpush3.bf16.msra.mxu1 %v3015_v16 }
 0x22b   :  { %2484 = vmatprep.subr.bf16.mxu1 %v2483_v24 }
 0x22d   :  { %2091 = vmatmul.mubr.f32.vlgmr.msra.gmra.mrb[0].mxu1 %v870_v18 }
 0x22e   :  { %2486 = vmatpush3.bf16.msra.mxu1 %v2483_v24  ;;  %2125 = vmatprep.mubr.f32.mxu1 %v3119_v41 }
 0x22f   :  { %2488 = vmatprep.subr.bf16.mxu1 %v2487_v53 }
 0x232   :  { %2490 = vmatpush3.bf16.msra.mxu1 %v2487_v53 }
 0x233   :  { %2492 = vmatprep.subr.bf16.mxu1 %v2491_v40 }
 0x236   :  { %2494 = vmatpush3.bf16.msra.mxu1 %v2491_v40 }
 0x237   :  { %2496 = vmatprep.subr.bf16.mxu1 %v2495_v57 }
 0x23a   :  { %2498 = vmatpush3.bf16.msra.mxu1 %v2495_v57 }
 0x23b   :  { %2500 = vmatprep.subr.bf16.mxu1 %v2499_v9 }
 0x23e   :  { %2502 = vmatpush3.bf16.msra.mxu1 %v2499_v9 }
 0x23f   :  { %2504 = vmatprep.subr.bf16.mxu1 %v2503_v14 }
 0x242   :  { %2506 = vmatpush3.bf16.msra.mxu1 %v2503_v14 }
 0x243   :  { %2508 = vmatprep.subr.bf16.mxu1 %v2507_v7 }
 0x246   :  { %2510 = vmatpush3.bf16.msra.mxu1 %v2507_v7 }
 0x247   :  { %2512 = vmatprep.subr.bf16.mxu1 %v2511_v38 }
 0x24a   :  { %2514 = vmatpush3.bf16.msra.mxu1 %v2511_v38 }
 0x24b   :  { %2516 = vmatprep.subr.bf16.mxu1 %v2878_v21 }
 0x24d   :  { %2126 = vmatmul.mubr.f32.vlgmr.msra.gmra.mrb[0].mxu1 %v3111_v35 }
 0x24e   :  { %2518 = vmatpush3.bf16.msra.mxu1 %v2878_v21  ;;  %2160 = vmatprep.mubr.f32.mxu1 %v3119_v41  ;;  %v1461_v21 = vlaneseq }
 0x24f   :  { %2520 = vmatprep.subr.bf16.mxu1 %v2886_v43 }
 0x252   :  { %2522 = vmatpush3.bf16.msra.mxu1 %v2886_v43  ;;  %v1462_v43 = vand.u32 127, %v1461_v21 }
 0x253   :  { %2524 = vmatprep.subr.bf16.mxu1 %v2901_v49 }
 0x254   :  { %vm1463_vm0 = vcmp.lt.s32.totalorder %v1462_v43, 32 }
 0x256   :  { %2526 = vmatpush3.bf16.msra.mxu1 %v2901_v49  ;;  %v1526_v49 = vld [vmem:[%s3302_s2 + $0x1] ss:$0 sm:$0xff]  ;;  %s2660_s2 = smov [#allocation7]  }
 0x257   :  { %2528 = vmatprep.subr.bf16.mxu1 %v2917_v3  ;;  %s1511_s13 = sshll.u32 %s2660_s2, 4  ;;  %s1512_s13 = int_to_ptr.vmem [resolvable:$true] %s1511_s13 }
 0x258   :  { %s2628_s14 = scalar_lea.vmem %s1512_s13, 256  ;;  %p2633_p3 = scmp.lt.s32.totalorder %s1512_s13, %s1512_s13 }
 0x259   :  { %p2629_p2 = scmp.ne.s32.totalorder %s1512_s13, %s2628_s14  ;;  %p2634_p4 = scmp.lt.s32.totalorder %s2628_s14, %s2628_s14 }
 0x25a   :  { %2530 = vmatpush3.bf16.msra.mxu1 %v2917_v3 }
 0x25b   :  { %2532 = vmatprep.subr.bf16.mxu1 %v2929_v4  ;;  %p2635_p5 = por %p2634_p4, %p2633_p3 }
 0x25d   :  { %p2636_p6 = pnand %p2635_p5, %p2629_p2 }
 0x25e   :  { %2534 = vmatpush3.bf16.msra.mxu1 %v2929_v4 }
 0x25f   :  { %2536 = vmatprep.subr.bf16.mxu1 %v2995_v23 }
 0x262   :  { %2538 = vmatpush3.bf16.msra.mxu1 %v2995_v23 }
 0x263   :  { %2540 = vmatprep.subr.bf16.mxu1 %v2999_v56 }
 0x266   :  { %2542 = vmatpush3.bf16.msra.mxu1 %v2999_v56 }
 0x267   :  { %2544 = vmatprep.subr.bf16.mxu1 %v3015_v16 }
 0x26a   :  { %2546 = vmatpush3.bf16.msra.mxu1 %v3015_v16 }
 0x26d   :  { %2161 = vmatmul.mubr.f32.vlgmr.msra.gmra.mrb[0].mxu1 %v3111_v35 }
 0x340   :  { %v2162_v3 = vpop.f32.mrb[0].mxu1 }
 0x341   :  { %v1451_v4 = vpop.f32.mrb[1].mxu1  ;;  %v2549_v48 = vadd.f32 %v2162_v3, %v1526_v49 }
 0x342   :  { %v2550_v23 = vadd.f32 %v1526_v49, %v1451_v4 }
 0x343   :  { %v1465_v56 = vsel %vm1463_vm0, %v2549_v48, 0.0 }
 0x344   :  { %v1464_v52 = vsel %vm1463_vm0, %v2550_v23, 0.0 }
 0x345   :  { %1466 = vadd.xlane.f32.xlu0 %v1464_v52 }
 0x349   :  { %1468 = vadd.xlane.f32.xlu0 %v1465_v56 }
 0x3d2   :  { %v1467_v16 = vpop.xlane.xlu0 %1466 }
 0x3d3   :  { %v1470_v39 = vmul.f32 0.03125, %v1467_v16 }
 0x3d5   :  { %v1472_v31 = vsub.f32 %v2550_v23, %v1470_v39 }
 0x3d6   :  { %v1469_v0 = vpop.xlane.xlu0 %1468 }
 0x3d7   :  { %v1471_v33 = vmul.f32 0.03125, %v1469_v0  ;;  %v1474_v55 = vsel %vm1463_vm0, %v1472_v31, 0.0 }
 0x3d8   :  { %v1476_v2 = vmul.f32 %v1474_v55, %v1474_v55 }
 0x3d9   :  { %v1473_v45 = vsub.f32 %v2549_v48, %v1471_v33 }
 0x3da   :  { %1478 = vadd.xlane.f32.xlu1 %v1476_v2 }
 0x3db   :  { %v1475_v62 = vsel %vm1463_vm0, %v1473_v45, 0.0 }
 0x3dc   :  { %v1477_v34 = vmul.f32 %v1475_v62, %v1475_v62 }
 0x3de   :  { %1480 = vadd.xlane.f32.xlu1 %v1477_v34 }
 0x467   :  { %v1479_v11 = vpop.xlane.xlu1 %1478 }
 0x468   :  { %v1482_v35 = vmul.f32 0.032258064, %v1479_v11 }
 0x46a   :  { %2576 = vrsqrt.f32 %v1482_v35  ;;  %vm1486_vm1 = vcmp.eq.f32.partialorder %v1482_v35, inf  ;;  %v1489_v5 = vand.u32 2147483648, %v1482_v35  ;;  %vm1488_vm2 = vcmp.eq.f32.partialorder %v1482_v35, 0.0 }
 0x46b   :  { %v1481_v41 = vpop.xlane.xlu1 %1480 }
 0x46c   :  { %v1483_v22 = vmul.f32 0.032258064, %v1481_v41 }
 0x46e   :  { %2578 = vrsqrt.f32 %v1483_v22  ;;  %vm1493_vm3 = vcmp.eq.f32.partialorder %v1483_v22, inf  ;;  %v1496_v32 = vand.u32 2147483648, %v1483_v22  ;;  %vm1495_vm4 = vcmp.eq.f32.partialorder %v1483_v22, 0.0 }
 0x474   :  { %v2577_v50 = vpop.eup %2576 }
 0x475   :  { %v1485_v27 = vmul.f32 %v2577_v50, %v1482_v35 }
 0x477   :  { %v1487_v13 = vsel %vm1486_vm1, %v1482_v35, %v1485_v27 }
 0x478   :  { %v2579_v17 = vpop.eup %2578  ;;  %v1490_v18 = vsel %vm1488_vm2, %v1489_v5, %v1487_v13 }
 0x479   :  { %v1492_v44 = vmul.f32 %v2579_v17, %v1483_v22  ;;  %v1498_v51 = vadd.f32 1e-06, %v1490_v18 }
 0x47b   :  { %v1494_v36 = vsel %vm1493_vm3, %v1483_v22, %v1492_v44  ;;  %2580 = vrcp.f32 %v1498_v51 }
 0x47c   :  { %v1497_v15 = vsel %vm1495_vm4, %v1496_v32, %v1494_v36 }
 0x47d   :  { %v1499_v20 = vadd.f32 1e-06, %v1497_v15 }
 0x47f   :  { %2582 = vrcp.f32 %v1499_v20 }
 0x485   :  { %v2581_v61 = vpop.eup %2580 }
 0x486   :  { %v1501_v29 = vmul.f32 %v2581_v61, %v1474_v55 }
 0x488   :  { %1504 = vst [vmem:[#allocation7] sm:$0xff] %v1501_v29 }
 0x489   :  { %v2583_v59 = vpop.eup %2582 }
 0x48a   :  { %v1503_v30 = vmul.f32 %v2583_v59, %v1475_v62 }
 0x48c   :  { %1505 = vst [vmem:[#allocation7 + $0x8] sm:$0xff] %v1503_v30 }
 0x48d   :  { %2639 = shalt.err (!%p2636_p6)
}
 0x48e   :  { %s2640_s17 = scalar_lea.hbm %s3303_s3, 256 }
 0x48f   :  { %p2641_p7 = scmp.ne.s32.totalorder %s3303_s3, %s2640_s17  ;;  %p2644_p8 = scmp.lt.u32.totalorder %s2640_s17, %s3303_s3 }
 0x491   :  { %p2646_p9 = pnand %p2644_p8, %p2641_p7 }
 0x493   :  { %2649 = shalt.err (!%p2646_p9)
}
 0x494   :  { %1517 = dma.vmem_to_hbm [thread:$0]  %s1512_s13, 256, %s3303_s3, [#allocation4], %s2657_s22, %s2657_s22, %s2658_s23  }
 0x495   :  { %2654 = dma.done.wait [#allocation4], 256  }
 0x496   :  { %2655 = vsyncadd [#allocation4], 4294967040 }
 0x497   :  { %1521 = vsyncpa [#allocation3], 1 }
 0x498   :  { %1522 = vsyncpa [#allocation6], 1 }
 0x499   :  { %1523 = vsyncpa [#allocation4], 1 }

</bundles_post_ra>
